<compile_context>
chip_gen: v5e
topology: v5e:2x2
jax: 0.10.0
libtpu: 0.0.40
codegen_flags: <defaults>
</compile_context>

<pallas_src>
import functools

import jax
import jax.numpy as jnp
from jax.experimental import pallas as pl
from jax.experimental.pallas import tpu as pltpu


def _round_up(v: int, m: int) -> int:
    return ((v + m - 1) // m) * m


# --------------------------------------------------------------------------
# Fully fused path: all layers in ONE pallas_call, weights VMEM-resident.
# --------------------------------------------------------------------------
def _fused_mlp_kernel(*refs, num_layers: int):
    """refs = (x_ref, w0_ref, b0_ref, w1_ref, b1_ref, ..., o_ref).

    x_ref: (tm, K0p) bf16; wi_ref: (Ki_p, Ni_p) bf16; bi_ref: (1, Ni_p) f32;
    o_ref: (tm, Tp).  ReLU after every layer except the last.
    """
    x_ref = refs[0]
    o_ref = refs[-1]
    wb_refs = refs[1:-1]

    # TODO(synk): for very deep/wide stacks, route `h` through an explicit
    # (2, tm, max_N) VMEM scratch ping-pong to bound live ranges / avoid spills.
    h = x_ref[...]  # bf16 activation, lives in vregs/VMEM for the whole MLP
    for i in range(num_layers):
        w_ref = wb_refs[2 * i]
        b_ref = wb_refs[2 * i + 1]
        y = jnp.dot(h, w_ref[...], preferred_element_type=jnp.float32)
        y = y + b_ref[...]
        if i < num_layers - 1:
            y = jnp.maximum(y, 0.0)
            h = y.astype(jnp.bfloat16)  # feed the MXU bf16 for the next layer
        else:
            h = y
    o_ref[...] = h.astype(o_ref.dtype)


def _fused_forward(x_pad, padded_params, *, mp, tm, k0p, tp, out_dtype, resident_bytes):
    num_layers = len(padded_params)
    in_specs = [pl.BlockSpec((tm, k0p), lambda i: (i, 0))]
    operands = [x_pad]

    flops = 0
    bytes_accessed = x_pad.size * x_pad.dtype.itemsize + mp * tp * jnp.dtype(out_dtype).itemsize
    for w_p, b_p in padded_params:
        kin, nout = w_p.shape
        # Constant index_map + single buffering: each weight/bias is DMA'd once,
        # stays VMEM-resident across the whole M grid, at 1x (not 2x) its size.
        in_specs.append(
            pl.BlockSpec((kin, nout), lambda i: (0, 0), pipeline_mode=pl.Buffered(1))
        )
        in_specs.append(
            pl.BlockSpec((1, nout), lambda i: (0, 0), pipeline_mode=pl.Buffered(1))
        )
        operands.append(w_p)
        operands.append(b_p.reshape(1, nout))
        flops += 2 * mp * kin * nout
        bytes_accessed += kin * nout * w_p.dtype.itemsize + nout * 4

    # Explicit scoped-VMEM limit sized to the resident footprint (+ headroom).
    vmem_limit = int(min(120 * 1024 * 1024,
                         max(16 * 1024 * 1024, resident_bytes * 5 // 4 + (4 << 20))))

    return pl.pallas_call(
        functools.partial(_fused_mlp_kernel, num_layers=num_layers),
        out_shape=jax.ShapeDtypeStruct((mp, tp), out_dtype),
        grid=(mp // tm,),
        in_specs=in_specs,
        out_specs=pl.BlockSpec((tm, tp), lambda i: (i, 0)),
        compiler_params=pltpu.CompilerParams(
            dimension_semantics=("parallel",),
            vmem_limit_bytes=vmem_limit,
        ),
        cost_estimate=pl.CostEstimate(
            flops=flops, transcendentals=0, bytes_accessed=bytes_accessed
        ),
    )(*operands)


# --------------------------------------------------------------------------
# Fallback path: per-layer pallas_call with K/N tiling + f32 accumulator.
# Used when the full weight stack cannot stay VMEM-resident (e.g. v7x 64 MiB/TC).
# --------------------------------------------------------------------------
def _layer_kernel(x_ref, w_ref, b_ref, o_ref, acc_ref, *, relu):
    k = pl.program_id(2)

    @pl.when(k == 0)
    def _():
        acc_ref[...] = jnp.zeros_like(acc_ref)

    acc_ref[...] += jnp.dot(x_ref[...], w_ref[...], preferred_element_type=jnp.float32)

    @pl.when(k == pl.num_programs(2) - 1)
    def _():
        y = acc_ref[...] + b_ref[...]
        if relu:
            y = jnp.maximum(y, 0.0)
        o_ref[...] = y.astype(o_ref.dtype)


def _layerwise_forward(x_pad, padded_params, *, mp, tm, out_dtype):
    num_layers = len(padded_params)
    h = x_pad
    for li, (w_p, b_p) in enumerate(padded_params):
        kp, np_ = w_p.shape
        last = li == num_layers - 1
        layer_dtype = out_dtype if last else jnp.bfloat16
        # Keep K/N tiles >= 256 (ideally 512) for the 256-deep MXU on v6e/v7x.
        tn = np_ if np_ <= 512 else 512
        tk = kp if kp <= 512 else 512
        out_isz = jnp.dtype(layer_dtype).itemsize

        flops = 2 * mp * kp * np_
        bytes_accessed = mp * kp * 2 + kp * np_ * 2 + np_ * 4 + mp * np_ * out_isz
        vmem_limit = int(min(
            120 * 1024 * 1024,
            max(16 * 1024 * 1024,
                2 * (tm * tk * 2 + tk * tn * 2 + tn * 4 + tm * tn * out_isz)
                + tm * tn * 4 + (4 << 20))))

        h = pl.pallas_call(
            functools.partial(_layer_kernel, relu=not last),
            out_shape=jax.ShapeDtypeStruct((mp, np_), layer_dtype),
            grid=(mp // tm, np_ // tn, kp // tk),
            in_specs=[
                pl.BlockSpec((tm, tk), lambda i, j, k: (i, k)),
                pl.BlockSpec((tk, tn), lambda i, j, k: (k, j)),
                pl.BlockSpec((1, tn), lambda i, j, k: (0, j)),
            ],
            out_specs=pl.BlockSpec((tm, tn), lambda i, j, k: (i, j)),
            scratch_shapes=[pltpu.VMEM((tm, tn), jnp.float32)],
            compiler_params=pltpu.CompilerParams(
                dimension_semantics=("parallel", "parallel", "arbitrary"),
                vmem_limit_bytes=vmem_limit,
            ),
            cost_estimate=pl.CostEstimate(
                flops=flops, transcendentals=0, bytes_accessed=bytes_accessed
            ),
        )(h, w_p, b_p.reshape(1, np_))
    return h


# --------------------------------------------------------------------------
# Params + wrapper
# --------------------------------------------------------------------------
def init_mlp_params(key, hidden_dim, input_dim, num_layers, target_size, time_dim):
    """Deterministic f32 params mirroring the nn.Linear stack (stored as (in, out))."""
    params = []
    current_size = time_dim * input_dim
    sizes = []
    for _ in range(num_layers - 1):
        sizes.append((current_size, hidden_dim))
        current_size = hidden_dim
    sizes.append((current_size, target_size))

    for fan_in, fan_out in sizes:
        key, kw, kb = jax.random.split(key, 3)
        bound = 1.0 / jnp.sqrt(fan_in)
        w_t = jax.random.uniform(kw, (fan_in, fan_out), jnp.float32, -bound, bound)
        b = jax.random.uniform(kb, (fan_out,), jnp.float32, -bound, bound)
        params.append((w_t, b))
    return params


def pad_and_cast_params(params):
    """Zero-pad every weight/bias to 128-lane multiples; weights -> bf16 for the MXU."""
    padded = []
    for w_t, b in params:
        fan_in, fan_out = w_t.shape
        kp, np_ = _round_up(fan_in, 128), _round_up(fan_out, 128)
        w_p = jnp.pad(w_t.astype(jnp.bfloat16), ((0, kp - fan_in), (0, np_ - fan_out)))
        b_p = jnp.pad(b, (0, np_ - fan_out))
        padded.append((w_p, b_p))
    return padded


def mlp_predictor_forward(
    x,
    padded_params,
    *,
    minibatch_size,
    input_dim,
    time_dim,
    target_size,
    out_dtype=jnp.float32,
    vmem_budget_bytes=48 * 1024 * 1024,  # fits v7x 64 MiB/TC with headroom
):
    """Fused MLPPredictor forward: flatten -> [Linear+ReLU]*(L-1) -> Linear."""
    k0 = input_dim * time_dim
    k0p = padded_params[0][0].shape[0]
    tp = padded_params[-1][0].shape[1]

    # --- batch (M) tiling ---
    mp8 = _round_up(minibatch_size, 8)
    if mp8 <= 8:
        tm = mp8
    else:
        # >=2 grid steps so v7x's 2nd TensorCore engages; cap at 256 (256-wide MXU).
        tm = min(256, _round_up(pl.cdiv(mp8, 2), 8))
    mp = _round_up(mp8, tm)

    # --- flatten + (only if needed) pad; jnp.pad fuses with the cast, no extra copy when aligned ---
    x2 = x.reshape(minibatch_size, k0).astype(jnp.bfloat16)
    if (mp, k0p) != (minibatch_size, k0):
        x_pad = jnp.pad(x2, ((0, mp - minibatch_size), (0, k0p - k0)))
    else:
        x_pad = x2

    # --- resident-VMEM footprint of the fused path (single-buffered weights) ---
    weight_bytes = sum(
        w.size * w.dtype.itemsize + b.size * 4 for w, b in padded_params
    )
    max_np = max(w.shape[1] for w, _ in padded_params)
    out_isz = jnp.dtype(out_dtype).itemsize
    act_bytes = 2 * tm * k0p * 2 + 2 * tm * tp * out_isz + 2 * tm * max_np * 4
    resident_bytes = weight_bytes + act_bytes

    if resident_bytes <= vmem_budget_bytes:
        out_padded = _fused_forward(
            x_pad, padded_params, mp=mp, tm=tm, k0p=k0p, tp=tp,
            out_dtype=out_dtype, resident_bytes=resident_bytes)
    else:
        out_padded = _layerwise_forward(
            x_pad, padded_params, mp=mp, tm=tm, out_dtype=out_dtype)

    if (mp, tp) != (minibatch_size, target_size):
        return out_padded[:minibatch_size, :target_size]
    return out_padded


# --------------------------------------------------------------------------
# Self-test
# --------------------------------------------------------------------------
if __name__ == "__main__":
    # Small shapes consistent with the module.
    hidden_dim = 32
    input_dim = 8
    num_layers = 3
    target_size = 8
    time_dim = 4
    minibatch_size = 8

    key = jax.random.PRNGKey(0)
    key, kx = jax.random.split(key)
    # (minibatch, time_dim, input_dim), flattened row-major in forward.
    x = jax.random.normal(kx, (minibatch_size, time_dim, input_dim), jnp.float32)

    params = init_mlp_params(key, hidden_dim, input_dim, num_layers, target_size, time_dim)
    padded_params = pad_and_cast_params(params)

    common = dict(
        minibatch_size=minibatch_size,
        input_dim=input_dim,
        time_dim=time_dim,
        target_size=target_size,
    )

    # Fused (weights-resident) path.
    out = jax.block_until_ready(mlp_predictor_forward(x, padded_params, **common))

    # Force the per-layer K/N-tiled fallback path (what big configs take on v7x).
    out_lw = jax.block_until_ready(
        mlp_predictor_forward(x, padded_params, vmem_budget_bytes=0, **common)
    )

    # Reference 1: bf16-MXU-mimicking (tight check of kernel numerics).
    ref = x.reshape(minibatch_size, input_dim * time_dim)
    ref32 = ref
    for i, (w_t, b) in enumerate(params):
        ref = jnp.dot(
            ref.astype(jnp.bfloat16),
            w_t.astype(jnp.bfloat16),
            preferred_element_type=jnp.float32,
        ) + b
        ref32 = jnp.dot(ref32, w_t) + b  # Reference 2: pure f32 (PyTorch parity, loose)
        if i < len(params) - 1:
            ref = jnp.maximum(ref, 0.0)
            ref32 = jnp.maximum(ref32, 0.0)

    assert out.shape == (minibatch_size, target_size)
    assert out_lw.shape == (minibatch_size, target_size)
    assert jnp.allclose(out, ref, atol=1e-3, rtol=1e-3), float(jnp.max(jnp.abs(out - ref)))
    assert jnp.allclose(out_lw, ref, atol=1e-3, rtol=1e-3), float(jnp.max(jnp.abs(out_lw - ref)))
    # bf16 MXU vs pure-f32 PyTorch: loose check documenting the expected ~1e-2 gap.
    assert jnp.allclose(out, ref32, atol=1e-1, rtol=1e-1), float(jnp.max(jnp.abs(out - ref32)))

    print("KERNEL_OK")
</pallas_src>

<mosaic_0001>
module attributes {stable_mosaic.version = 11 : i64} {
  func.func @_fused_mlp_kernel(%arg0: i32, %arg1: memref<8x128xbf16, #tpu.memory_space<vmem>>, %arg2: memref<128x128xbf16, #tpu.memory_space<vmem>>, %arg3: memref<1x128xf32, #tpu.memory_space<vmem>>, %arg4: memref<128x128xbf16, #tpu.memory_space<vmem>>, %arg5: memref<1x128xf32, #tpu.memory_space<vmem>>, %arg6: memref<128x128xbf16, #tpu.memory_space<vmem>>, %arg7: memref<1x128xf32, #tpu.memory_space<vmem>>, %arg8: memref<8x128xf32, #tpu.memory_space<vmem>>) attributes {dimension_semantics = [#tpu.dimension_semantics<parallel>], iteration_bounds = array<i64: 1>, scalar_prefetch = 0 : i64, scratch_operands = 0 : i64, tpu.core_type = #tpu.core_type<tc>, window_params = [{transform_indices = @transform_0, window_bounds = array<i64: 8, 128>}, {pipeline_mode = #tpu.pipeline_mode<synchronous>, transform_indices = @transform_1, window_bounds = array<i64: 128, 128>}, {pipeline_mode = #tpu.pipeline_mode<synchronous>, transform_indices = @transform_2, window_bounds = array<i64: 1, 128>}, {pipeline_mode = #tpu.pipeline_mode<synchronous>, transform_indices = @transform_3, window_bounds = array<i64: 128, 128>}, {pipeline_mode = #tpu.pipeline_mode<synchronous>, transform_indices = @transform_4, window_bounds = array<i64: 1, 128>}, {pipeline_mode = #tpu.pipeline_mode<synchronous>, transform_indices = @transform_5, window_bounds = array<i64: 128, 128>}, {pipeline_mode = #tpu.pipeline_mode<synchronous>, transform_indices = @transform_6, window_bounds = array<i64: 1, 128>}, {transform_indices = @transform_7, window_bounds = array<i64: 8, 128>}]} {
    %c0 = arith.constant 0 : index
    %c0_0 = arith.constant 0 : index
    %0 = vector.load %arg1[%c0, %c0_0] : memref<8x128xbf16, #tpu.memory_space<vmem>>, vector<8x128xbf16>
    %c0_1 = arith.constant 0 : index
    %c0_2 = arith.constant 0 : index
    %1 = vector.load %arg2[%c0_1, %c0_2] : memref<128x128xbf16, #tpu.memory_space<vmem>>, vector<128x128xbf16>
    %cst = arith.constant dense<0.000000e+00> : vector<8x128xf32>
    %2 = tpu.matmul %0, %1, %cst {dimension_numbers = #tpu.dot_dimension_numbers<[1], [0], [0], [1], [0, 0, 1, 1], [], []>} : vector<8x128xbf16>, vector<128x128xbf16>, vector<8x128xf32> -> vector<8x128xf32>
    %c0_3 = arith.constant 0 : index
    %c0_4 = arith.constant 0 : index
    %3 = vector.load %arg3[%c0_3, %c0_4] : memref<1x128xf32, #tpu.memory_space<vmem>>, vector<1x128xf32>
    %4 = vector.broadcast %3 : vector<1x128xf32> to vector<8x128xf32>
    %5 = arith.addf %2, %4 : vector<8x128xf32>
    %cst_5 = arith.constant 0.000000e+00 : f32
    %6 = vector.broadcast %cst_5 : f32 to vector<8x128xf32>
    %7 = arith.maximumf %5, %6 : vector<8x128xf32>
    %8 = arith.truncf %7 : vector<8x128xf32> to vector<8x128xbf16>
    %c0_6 = arith.constant 0 : index
    %c0_7 = arith.constant 0 : index
    %9 = vector.load %arg4[%c0_6, %c0_7] : memref<128x128xbf16, #tpu.memory_space<vmem>>, vector<128x128xbf16>
    %cst_8 = arith.constant dense<0.000000e+00> : vector<8x128xf32>
    %10 = tpu.matmul %8, %9, %cst_8 {dimension_numbers = #tpu.dot_dimension_numbers<[1], [0], [0], [1], [0, 0, 1, 1], [], []>} : vector<8x128xbf16>, vector<128x128xbf16>, vector<8x128xf32> -> vector<8x128xf32>
    %c0_9 = arith.constant 0 : index
    %c0_10 = arith.constant 0 : index
    %11 = vector.load %arg5[%c0_9, %c0_10] : memref<1x128xf32, #tpu.memory_space<vmem>>, vector<1x128xf32>
    %12 = vector.broadcast %11 : vector<1x128xf32> to vector<8x128xf32>
    %13 = arith.addf %10, %12 : vector<8x128xf32>
    %cst_11 = arith.constant 0.000000e+00 : f32
    %14 = vector.broadcast %cst_11 : f32 to vector<8x128xf32>
    %15 = arith.maximumf %13, %14 : vector<8x128xf32>
    %16 = arith.truncf %15 : vector<8x128xf32> to vector<8x128xbf16>
    %c0_12 = arith.constant 0 : index
    %c0_13 = arith.constant 0 : index
    %17 = vector.load %arg6[%c0_12, %c0_13] : memref<128x128xbf16, #tpu.memory_space<vmem>>, vector<128x128xbf16>
    %cst_14 = arith.constant dense<0.000000e+00> : vector<8x128xf32>
    %18 = tpu.matmul %16, %17, %cst_14 {dimension_numbers = #tpu.dot_dimension_numbers<[1], [0], [0], [1], [0, 0, 1, 1], [], []>} : vector<8x128xbf16>, vector<128x128xbf16>, vector<8x128xf32> -> vector<8x128xf32>
    %c0_15 = arith.constant 0 : index
    %c0_16 = arith.constant 0 : index
    %19 = vector.load %arg7[%c0_15, %c0_16] : memref<1x128xf32, #tpu.memory_space<vmem>>, vector<1x128xf32>
    %20 = vector.broadcast %19 : vector<1x128xf32> to vector<8x128xf32>
    %21 = arith.addf %18, %20 : vector<8x128xf32>
    %c0_17 = arith.constant 0 : index
    %c0_18 = arith.constant 0 : index
    %22 = vector.load %arg8[%c0_17, %c0_18] : memref<8x128xf32, #tpu.memory_space<vmem>>, vector<8x128xf32>
    tpu.vector_store %arg8[%c0_17, %c0_18], %21 {strides = array<i32>} : memref<8x128xf32, #tpu.memory_space<vmem>>, vector<8x128xf32>,
    return
  }
  func.func @transform_0(%arg0: i32) -> (i32, i32) {
    %c0_i32 = arith.constant 0 : i32
    %c0_i32_0 = arith.constant 0 : i32
    return %arg0, %c0_i32 : i32, i32
  }
  func.func @transform_1(%arg0: i32) -> (i32, i32) {
    %c0_i32 = arith.constant 0 : i32
    %c0_i32_0 = arith.constant 0 : i32
    %c0_i32_1 = arith.constant 0 : i32
    return %c0_i32, %c0_i32_0 : i32, i32
  }
  func.func @transform_2(%arg0: i32) -> (i32, i32) {
    %c0_i32 = arith.constant 0 : i32
    %c0_i32_0 = arith.constant 0 : i32
    %c0_i32_1 = arith.constant 0 : i32
    return %c0_i32, %c0_i32_0 : i32, i32
  }
  func.func @transform_3(%arg0: i32) -> (i32, i32) {
    %c0_i32 = arith.constant 0 : i32
    %c0_i32_0 = arith.constant 0 : i32
    %c0_i32_1 = arith.constant 0 : i32
    return %c0_i32, %c0_i32_0 : i32, i32
  }
  func.func @transform_4(%arg0: i32) -> (i32, i32) {
    %c0_i32 = arith.constant 0 : i32
    %c0_i32_0 = arith.constant 0 : i32
    %c0_i32_1 = arith.constant 0 : i32
    return %c0_i32, %c0_i32_0 : i32, i32
  }
  func.func @transform_5(%arg0: i32) -> (i32, i32) {
    %c0_i32 = arith.constant 0 : i32
    %c0_i32_0 = arith.constant 0 : i32
    %c0_i32_1 = arith.constant 0 : i32
    return %c0_i32, %c0_i32_0 : i32, i32
  }
  func.func @transform_6(%arg0: i32) -> (i32, i32) {
    %c0_i32 = arith.constant 0 : i32
    %c0_i32_0 = arith.constant 0 : i32
    %c0_i32_1 = arith.constant 0 : i32
    return %c0_i32, %c0_i32_0 : i32, i32
  }
  func.func @transform_7(%arg0: i32) -> (i32, i32) {
    %c0_i32 = arith.constant 0 : i32
    %c0_i32_0 = arith.constant 0 : i32
    return %arg0, %c0_i32 : i32, i32
  }
}

</mosaic_0001>

<bundles_post_ra>
// kernel: tpu_custom_call.1
= control target key start
LH: loop header
LB: loop body
LE: loop exit
PB: predicated region body
PF: predicated region fallthrough
CT: control target
= control target key end

     0   :  { %12 = vsyncpa [#allocation3], 0  ;;  %s685_s0 = inlined_call_operand.hbm [shape: bf16[8,128], index: 0, kind: input, shape index: {}]   ;;  %s686_s1 = inlined_call_operand.hbm [shape: bf16[128,128], index: 1, kind: input, shape index: {}]   ;;  %s687_s2 = inlined_call_operand.vmem [shape: f32[1,128], index: 2, kind: input, shape index: {}]   ;;  %s688_s3 = inlined_call_operand.hbm [shape: bf16[128,128], index: 3, kind: input, shape index: {}]   ;;  %s689_s4 = inlined_call_operand.vmem [shape: f32[1,128], index: 4, kind: input, shape index: {}]   ;;  %s690_s5 = inlined_call_operand.hbm [shape: bf16[128,128], index: 5, kind: input, shape index: {}]   ;;  %s691_s6 = inlined_call_operand.vmem [shape: f32[1,128], index: 6, kind: input, shape index: {}]   ;;  %s692_s7 = inlined_call_operand.hbm [shape: f32[8,128], index: 7, kind: output, shape index: {}]  }
   0x1   :  { %13 = vsyncpa [#allocation6], 0 }
   0x2   :  { %14 = vsyncpa [#allocation9], 0  ;;  %s31_s26 = sshll.u32 %s686_s1, 4  ;;  %s32_s26 = int_to_ptr.hbm [resolvable:$true] %s31_s26 }
   0x3   :  { %15 = vsyncpa [#allocation4], 0  ;;  %s614_s27 = smov [#allocation5]   ;;  %s21_s8 = sshll.u32 %s685_s0, 4  ;;  %s22_s8 = int_to_ptr.hbm [resolvable:$true] %s21_s8 }
   0x4   :  { %s33_s28 = sshll.u32 %s614_s27, 4  ;;  %s615_s9 = smov 64   ;;  %s34_s28 = int_to_ptr.vmem [resolvable:$true] %s33_s28 }
   0x5   :  { %s616_s10 = smov 4   ;;  %s617_s11 = smov [#allocation2]  }
   0x6   :  { %39 = dma.hbm_to_vmem [thread:$0]  %s32_s26, 1024, %s34_s28, [#allocation6], %s615_s9, %s615_s9, %s616_s10  }
   0x7   :  { %s23_s12 = sshll.u32 %s617_s11, 4  ;;  %s46_s15 = sshll.u32 %s688_s3, 4  ;;  %s24_s12 = int_to_ptr.vmem [resolvable:$true] %s23_s12  ;;  %s47_s15 = int_to_ptr.hbm [resolvable:$true] %s46_s15 }
   0x8   :  { %26 = dma.hbm_to_vmem [thread:$0]  %s22_s8, 64, %s24_s12, [#allocation3]  }
   0x9   :  { %s61_s17 = sshll.u32 %s690_s5, 4  ;;  %s618_s18 = smov [#allocation7]   ;;  %s62_s17 = int_to_ptr.hbm [resolvable:$true] %s61_s17 }
   0xa   :  { %s48_s19 = sshll.u32 %s618_s18, 4  ;;  %s619_s0 = smov [#allocation8]   ;;  %s49_s19 = int_to_ptr.vmem [resolvable:$true] %s48_s19 }
   0xb   :  { %54 = dma.hbm_to_vmem [thread:$0]  %s47_s15, 1024, %s49_s19, [#allocation6], %s615_s9, %s615_s9, %s616_s10  }
   0xc   :  { %s63_s20 = sshll.u32 %s619_s0, 4  ;;  %s64_s20 = int_to_ptr.vmem [resolvable:$true] %s63_s20 }
   0xd   :  { %69 = dma.hbm_to_vmem [thread:$0]  %s62_s17, 1024, %s64_s20, [#allocation9], %s615_s9, %s615_s9, %s616_s10  }
   0xe   :  { %606 = dma.done.wait [#allocation3], 64  }
   0xf   :  { %607 = vsyncadd [#allocation3], 4294967232 }
  0x10   :  { %608 = dma.done.wait [#allocation6], 2048  }
  0x11   :  { %609 = vsyncadd [#allocation6], 4294965248 }
  0x12   :  { %610 = dma.done.wait [#allocation9], 1024  }
  0x13   :  { %611 = vsyncadd [#allocation9], 4294966272  ;;  %v459_v0 = vld [vmem:[#allocation5 + $0x38] sm:$0xff]  ;;  %v458_v1 = vld [vmem:[#allocation5 + $0x30] sm:$0xff]  ;;  %s620_s24 = smov [#allocation10]   ;;  %s344_s28 = sshll.u32 %s692_s7, 4  ;;  %s345_s28 = int_to_ptr.hbm [resolvable:$true] %s344_s28 }
  0x14   :  { %157 = vmatpush.bf16.msra.mxu0 %v459_v0  ;;  %v467_v2 = vld [vmem:[#allocation7 + $0x38] sm:$0xff]  ;;  %v466_v3 = vld [vmem:[#allocation7 + $0x30] sm:$0xff]  ;;  %v457_v4 = vld [vmem:[#allocation5 + $0x28] sm:$0xff]  ;;  %s342_s25 = sshll.u32 %s620_s24, 4  ;;  %s343_s25 = int_to_ptr.vmem [resolvable:$true] %s342_s25 }
  0x15   :  { %240 = vmatpush.bf16.msra.mxu1 %v467_v2  ;;  %v465_v5 = vld [vmem:[#allocation7 + $0x28] sm:$0xff]  ;;  %v456_v6 = vld [vmem:[#allocation5 + $0x20] sm:$0xff]  ;;  %v455_v8 = vld [vmem:[#allocation5 + $0x18] sm:$0xff] }
  0x16   :  { %v464_v7 = vld [vmem:[#allocation7 + $0x20] sm:$0xff]  ;;  %v463_v9 = vld [vmem:[#allocation7 + $0x18] sm:$0xff]  ;;  %v454_v10 = vld [vmem:[#allocation5 + $0x10] sm:$0xff] }
  0x17   :  { %v462_v11 = vld [vmem:[#allocation7 + $0x10] sm:$0xff]  ;;  %v453_v12 = vld [vmem:[#allocation5 + $0x8] sm:$0xff]  ;;  %v452_v13 = vld [vmem:[#allocation5] sm:$0xff] }
  0x18   :  { %158 = vmatpush.bf16.msra.mxu0 %v458_v1  ;;  %v88_v14 = vld [vmem:[#allocation2] sm:$0xf]  ;;  %v461_v15 = vld [vmem:[#allocation7 + $0x8] sm:$0xff]  ;;  %v460_v16 = vld [vmem:[#allocation7] sm:$0xff] }
  0x19   :  { %241 = vmatpush.bf16.msra.mxu1 %v466_v3  ;;  %v475_v17 = vld [vmem:[#allocation8 + $0x38] sm:$0xff]  ;;  %v474_v18 = vld [vmem:[#allocation8 + $0x30] sm:$0xff]  ;;  %v473_v19 = vld [vmem:[#allocation8 + $0x28] sm:$0xff] }
  0x1a   :  { %323 = vmatpush.bf16.msra.mxu2 %v475_v17  ;;  %v472_v20 = vld [vmem:[#allocation8 + $0x20] sm:$0xff]  ;;  %v471_v21 = vld [vmem:[#allocation8 + $0x18] sm:$0xff]  ;;  %v470_v22 = vld [vmem:[#allocation8 + $0x10] sm:$0xff] }
  0x1b   :  { %v483_v23 = vld [vmem:[%s687_s2] ss:$0 sm:$0xff]  ;;  %v469_v29 = vld [vmem:[#allocation8 + $0x8] sm:$0xff]  ;;  %v468_v30 = vld [vmem:[#allocation8] sm:$0xff] }
  0x1c   :  { %159 = vmatpush.bf16.msra.mxu0 %v457_v4  ;;  %v484_v31 = vld [vmem:[%s689_s4] ss:$0 sm:$0xff] }
  0x1d   :  { %242 = vmatpush.bf16.msra.mxu1 %v465_v5  ;;  %v485_v37 = vld [vmem:[%s691_s6] ss:$0 sm:$0xff] }
  0x1e   :  { %324 = vmatpush.bf16.msra.mxu2 %v474_v18 }
  0x20   :  { %160 = vmatpush.bf16.msra.mxu0 %v456_v6 }
  0x21   :  { %243 = vmatpush.bf16.msra.mxu1 %v464_v7 }
  0x22   :  { %325 = vmatpush.bf16.msra.mxu2 %v473_v19 }
  0x24   :  { %161 = vmatpush.bf16.msra.mxu0 %v455_v8 }
  0x25   :  { %244 = vmatpush.bf16.msra.mxu1 %v463_v9 }
  0x26   :  { %326 = vmatpush.bf16.msra.mxu2 %v472_v20 }
  0x28   :  { %162 = vmatpush.bf16.msra.mxu0 %v454_v10 }
  0x29   :  { %245 = vmatpush.bf16.msra.mxu1 %v462_v11 }
  0x2a   :  { %327 = vmatpush.bf16.msra.mxu2 %v471_v21 }
  0x2c   :  { %163 = vmatpush.bf16.msra.mxu0 %v453_v12 }
  0x2d   :  { %246 = vmatpush.bf16.msra.mxu1 %v461_v15 }
  0x2e   :  { %328 = vmatpush.bf16.msra.mxu2 %v470_v22 }
  0x30   :  { %164 = vmatpush.bf16.msra.mxu0 %v452_v13 }
  0x31   :  { %247 = vmatpush.bf16.msra.mxu1 %v460_v16 }
  0x32   :  { %329 = vmatpush.bf16.msra.mxu2 %v469_v29 }
  0x33   :  { %165 = vmatmul.bf16.vlgmr.msra.gmra.mxu0 %v88_v14 }
  0x36   :  { %330 = vmatpush.bf16.msra.mxu2 %v468_v30 }
  0xb0   :  { %v166_v24 = vpop.f32.mrf.mxu0 }
  0xb1   :  { %v167_v25 = vadd.f32 %v483_v23, %v166_v24 }
  0xb3   :  { %v170_v26 = vmax.f32 %v167_v25, 0.0 }
  0xb5   :  { %v171_v27 = vpack.c.bf16 %v170_v26, %v170_v26 }
  0xb7   :  { %248 = vmatmul.bf16.vlgmr.msra.gmra.mxu1 %v171_v27 }
  0xb8   :  { %v168_v28 = vpop.f32.mrf.mxu0 }
 0x134   :  { %v249_v32 = vpop.f32.mrf.mxu1 }
 0x135   :  { %v250_v33 = vadd.f32 %v484_v31, %v249_v32 }
 0x137   :  { %v253_v34 = vmax.f32 %v250_v33, 0.0 }
 0x139   :  { %v254_v35 = vpack.c.bf16 %v253_v34, %v253_v34 }
 0x13b   :  { %331 = vmatmul.bf16.vlgmr.msra.gmra.mxu2 %v254_v35 }
 0x13c   :  { %v251_v36 = vpop.f32.mrf.mxu1 }
 0x1be   :  { %v332_v38 = vpop.f32.mrf.mxu2 }
 0x1bf   :  { %v333_v39 = vadd.f32 %v485_v37, %v332_v38 }
 0x1c1   :  { %336 = vst [vmem:[#allocation10] sm:$0xff] %v333_v39 }
 0x1c2   :  { %347 = dma.vmem_to_hbm [thread:$0]  %s343_s25, 128, %s345_s28, [#allocation4]  }
 0x1c6   :  { %v334_v40 = vpop.f32.mrf.mxu2 }
 0x1c7   :  { %612 = dma.done.wait [#allocation4], 128  }
 0x1c8   :  { %613 = vsyncadd [#allocation4], 4294967168 }
 0x1c9   :  { %352 = vsyncpa [#allocation3], 1 }
 0x1ca   :  { %353 = vsyncpa [#allocation6], 1 }
 0x1cb   :  { %354 = vsyncpa [#allocation9], 1 }
 0x1cc   :  { %355 = vsyncpa [#allocation4], 1 }

</bundles_post_ra>
